<compile_context>
chip_gen: v7x
topology: tpu7x:2x2x1
jax: 0.10.0
libtpu: 0.0.40
codegen_flags: <defaults>
</compile_context>

<pallas_src>
import math

import jax
import jax.numpy as jnp
from jax.experimental import pallas as pl
from jax.experimental.pallas import tpu as pltpu


def _featurenorm_kernel(x_ref, mean_ref, inv_std_ref, o_ref):
    # x_ref: (tm, Ff); mean_ref / inv_std_ref: (1, Ff) f32, broadcast over rows.
    x = x_ref[...].astype(jnp.float32)
    o_ref[...] = ((x - mean_ref[...]) * inv_std_ref[...]).astype(o_ref.dtype)


def _round_up(v, m):
    return ((v + m - 1) // m) * m


def _vmem_capacity_bytes():
    """Physical VMEM capacity, conservative (v7x) fallback if query fails."""
    try:
        info = pltpu.get_tpu_info()
        cap = getattr(info, "vmem_capacity_bytes", None)
        if cap:
            return int(cap)
    except Exception:
        pass
    return 64 * 1024 * 1024


def feature_norm_jet(x, mean, std, *, fold_lanes=True):
    """(x - mean) / std with per-feature mean/std broadcast over leading axes."""
    orig_shape = x.shape
    F = orig_shape[-1]
    assert mean.shape == (F,) and std.shape == (F,)

    dtype = x.dtype
    dtype_bytes = dtype.itemsize
    M = 1
    for d in orig_shape[:-1]:
        M *= d
    if M == 0 or F == 0:
        return x

    # Per-feature stats in f32 (parity with f32 PyTorch buffers); reciprocal
    # precomputed so the kernel is pure VPU sub+mul.
    mean_f32 = mean.astype(jnp.float32)
    inv_std_f32 = 1.0 / std.astype(jnp.float32)

    # Lane folding: pack g consecutive rows into one lane-dense row of width
    # Ff = lcm(F, 128).  Only when no padding is required (M % g == 0) and the
    # folded row stays narrow, so the wrapper adds zero pad/slice HBM passes.
    # TODO(synk): profile whether the (M,F)<->(Mf,Ff) reshapes lower to HBM
    # relayout copies on the deployed XLA version; if they do, either keep the
    # surrounding graph in the folded layout or call with fold_lanes=False.
    LANES = 128
    g, Ff = 1, F
    if fold_lanes and F % LANES != 0:
        lcm = (F * LANES) // math.gcd(F, LANES)
        cand_g = lcm // F
        if M % cand_g == 0 and lcm * dtype_bytes <= 16 * 1024:
            g, Ff = cand_g, lcm
    Mf = M // g

    xf = x.reshape(Mf, Ff)
    if g > 1:
        mean_row = jnp.tile(mean_f32, g).reshape(1, Ff)
        inv_std_row = jnp.tile(inv_std_f32, g).reshape(1, Ff)
    else:
        mean_row = mean_f32.reshape(1, Ff)
        inv_std_row = inv_std_f32.reshape(1, Ff)

    # --- row-tile selection ---------------------------------------------------
    sub = {4: 8, 2: 16, 1: 32}.get(dtype_bytes, 8)   # packed sublane count
    row_bytes = max(1, Ff * dtype_bytes)

    # Per-generation VMEM budgeting: v5e/v6e have 128 MiB VMEM, v7x only 64 MiB.
    cap = _vmem_capacity_bytes()
    if cap >= 100 * 1024 * 1024:            # v5e / v6e
        per_buf_budget = 16 * 1024 * 1024
        vmem_cap = 96 * 1024 * 1024
    else:                                    # v7x (or unknown -> conservative)
        per_buf_budget = 8 * 1024 * 1024
        vmem_cap = 48 * 1024 * 1024

    if Mf <= sub:
        tm = Mf                              # full extent -> valid block shape
    else:
        tm = max(sub, (per_buf_budget // row_bytes) // sub * sub)
        tm = min(tm, _round_up(Mf, sub))
        # Guarantee >=2 grid steps when there's enough work so v7x's two
        # TensorCores both get a shard (near-free on single-core chips).
        if Mf >= 2 * sub:
            tm = min(tm, max(sub, _round_up(pl.cdiv(Mf, 2), sub)))

    grid = (pl.cdiv(Mf, tm),)                # ragged last block masked by Pallas

    tile_bytes = tm * row_bytes
    vmem_limit = int(min(vmem_cap, max(32 * 1024 * 1024, 4 * tile_bytes + (2 << 20))))

    cost = pl.CostEstimate(
        flops=2 * Mf * Ff,
        transcendentals=0,
        bytes_accessed=2 * Mf * Ff * dtype_bytes + 2 * Ff * 4,
    )

    out = pl.pallas_call(
        _featurenorm_kernel,
        out_shape=jax.ShapeDtypeStruct((Mf, Ff), dtype),
        grid_spec=pltpu.PrefetchScalarGridSpec(
            num_scalar_prefetch=0,
            grid=grid,
            in_specs=[
                pl.BlockSpec((tm, Ff), lambda i: (i, 0)),
                pl.BlockSpec((1, Ff), lambda i: (0, 0)),
                pl.BlockSpec((1, Ff), lambda i: (0, 0)),
            ],
            out_specs=pl.BlockSpec((tm, Ff), lambda i: (i, 0)),
        ),
        compiler_params=pltpu.CompilerParams(
            dimension_semantics=("parallel",),
            vmem_limit_bytes=vmem_limit,
        ),
        cost_estimate=cost,
    )(xf, mean_row, inv_std_row)

    return out.reshape(orig_shape)


if __name__ == "__main__":
    key = jax.random.PRNGKey(0)
    kx, km, ks = jax.random.split(key, 3)

    B, N, F = 2, 8, 32  # batch of 2 jets, 8 particles each, 32 features
    x = jax.random.normal(kx, (B, N, F), dtype=jnp.float32)
    # deterministic "global stats" buffers (per-feature, f32 like PyTorch buffers)
    mean = jax.random.normal(km, (F,), dtype=jnp.float32)
    std = jax.random.uniform(ks, (F,), dtype=jnp.float32, minval=0.5, maxval=2.0)

    y = feature_norm_jet(x, mean, std)
    y = jax.block_until_ready(y)

    # reference check (plain JAX, same broadcasting semantics as PyTorch forward)
    y_ref = (x - mean) / std
    assert jnp.allclose(y, y_ref, atol=1e-5, rtol=1e-5), "mismatch vs reference"

    # also exercise the non-folded path (F not foldable without padding)
    x_odd = jax.random.normal(kx, (3, 5, F), dtype=jnp.float32)  # M=15, 15 % 4 != 0
    y_odd = jax.block_until_ready(feature_norm_jet(x_odd, mean, std))
    assert jnp.allclose(y_odd, (x_odd - mean) / std, atol=1e-5, rtol=1e-5)

    print("KERNEL_OK")
</pallas_src>

<mosaic_0001>
module attributes {stable_mosaic.version = 11 : i64} {
  func.func @_featurenorm_kernel(%arg0: i32, %arg1: memref<4x128xf32, #tpu.memory_space<vmem>>, %arg2: memref<1x128xf32, #tpu.memory_space<vmem>>, %arg3: memref<1x128xf32, #tpu.memory_space<vmem>>, %arg4: memref<4x128xf32, #tpu.memory_space<vmem>>) attributes {dimension_semantics = [#tpu.dimension_semantics<parallel>], iteration_bounds = array<i64: 1>, scalar_prefetch = 0 : i64, scratch_operands = 0 : i64, tpu.core_type = #tpu.core_type<tc>, window_params = [{transform_indices = @transform_0, window_bounds = array<i64: 4, 128>}, {pipeline_mode = #tpu.pipeline_mode<synchronous>, transform_indices = @transform_1, window_bounds = array<i64: 1, 128>}, {pipeline_mode = #tpu.pipeline_mode<synchronous>, transform_indices = @transform_2, window_bounds = array<i64: 1, 128>}, {transform_indices = @transform_3, window_bounds = array<i64: 4, 128>}]} {
    %c0 = arith.constant 0 : index
    %c0_0 = arith.constant 0 : index
    %0 = vector.load %arg1[%c0, %c0_0] : memref<4x128xf32, #tpu.memory_space<vmem>>, vector<4x128xf32>
    %c0_1 = arith.constant 0 : index
    %c0_2 = arith.constant 0 : index
    %1 = vector.load %arg2[%c0_1, %c0_2] : memref<1x128xf32, #tpu.memory_space<vmem>>, vector<1x128xf32>
    %2 = vector.broadcast %1 : vector<1x128xf32> to vector<4x128xf32>
    %3 = arith.subf %0, %2 : vector<4x128xf32>
    %c0_3 = arith.constant 0 : index
    %c0_4 = arith.constant 0 : index
    %4 = vector.load %arg3[%c0_3, %c0_4] : memref<1x128xf32, #tpu.memory_space<vmem>>, vector<1x128xf32>
    %5 = vector.broadcast %4 : vector<1x128xf32> to vector<4x128xf32>
    %6 = arith.mulf %3, %5 : vector<4x128xf32>
    %c0_5 = arith.constant 0 : index
    %c0_6 = arith.constant 0 : index
    %7 = vector.load %arg4[%c0_5, %c0_6] : memref<4x128xf32, #tpu.memory_space<vmem>>, vector<4x128xf32>
    tpu.vector_store %arg4[%c0_5, %c0_6], %6 {strides = array<i32>} : memref<4x128xf32, #tpu.memory_space<vmem>>, vector<4x128xf32>,
    return
  }
  func.func @transform_0(%arg0: i32) -> (i32, i32) {
    %c0_i32 = arith.constant 0 : i32
    %c0_i32_0 = arith.constant 0 : i32
    return %arg0, %c0_i32 : i32, i32
  }
  func.func @transform_1(%arg0: i32) -> (i32, i32) {
    %c0_i32 = arith.constant 0 : i32
    %c0_i32_0 = arith.constant 0 : i32
    %c0_i32_1 = arith.constant 0 : i32
    return %c0_i32, %c0_i32_0 : i32, i32
  }
  func.func @transform_2(%arg0: i32) -> (i32, i32) {
    %c0_i32 = arith.constant 0 : i32
    %c0_i32_0 = arith.constant 0 : i32
    %c0_i32_1 = arith.constant 0 : i32
    return %c0_i32, %c0_i32_0 : i32, i32
  }
  func.func @transform_3(%arg0: i32) -> (i32, i32) {
    %c0_i32 = arith.constant 0 : i32
    %c0_i32_0 = arith.constant 0 : i32
    return %arg0, %c0_i32 : i32, i32
  }
}

</mosaic_0001>

<bundles_post_ra>
// kernel: tpu_custom_call.1
= control target key start
LH: loop header
LB: loop body
LE: loop exit
PB: predicated region body
PF: predicated region fallthrough
CT: control target
= control target key end

     0   :  { %8 = vsyncpa [#allocation3], 0  ;;  %s164_s0 = inlined_call_operand.hbm [shape: f32[4,128], index: 0, kind: input, shape index: {}]   ;;  %s165_s1 = inlined_call_operand.vmem [shape: f32[1,128], index: 1, kind: input, shape index: {}]   ;;  %s166_s2 = inlined_call_operand.vmem [shape: f32[1,128], index: 2, kind: input, shape index: {}]   ;;  %s167_s3 = inlined_call_operand.hbm [shape: f32[4,128], index: 3, kind: output, shape index: {}]  }
   0x1   :  { %9 = vsyncpa [#allocation4], 0  ;;  %s112_s12 = smov [#allocation2]   ;;  %s64_s16 = scalar_lea.hbm %s164_s0, 64 }
   0x2   :  { %s16_s13 = sshll.u32 %s112_s12, 4  ;;  %p65_p0 = scmp.ne.s32.totalorder %s164_s0, %s64_s16  ;;  %s17_s13 = int_to_ptr.vmem [resolvable:$true] %s16_s13 }
   0x3   :  { %p68_p1 = scmp.lt.u32.totalorder %s64_s16, %s164_s0 }
   0x5   :  { %p70_p2 = pnand %p68_p1, %p65_p0 }
   0x7   :  { %73 = shalt.err (!%p70_p2)
}
   0x8   :  { %s74_s21 = scalar_lea.vmem %s17_s13, 64  ;;  %p79_p4 = scmp.lt.s32.totalorder %s17_s13, %s17_s13 }
   0x9   :  { %p75_p3 = scmp.ne.s32.totalorder %s17_s13, %s74_s21  ;;  %p80_p5 = scmp.lt.s32.totalorder %s74_s21, %s74_s21 }
   0xb   :  { %p81_p6 = por %p80_p5, %p79_p4 }
   0xd   :  { %p82_p7 = pnand %p81_p6, %p75_p3 }
   0xf   :  { %85 = shalt.err (!%p82_p7)
}
  0x10   :  { %19 = dma.hbm_to_vmem [thread:$0]  %s164_s0, 64, %s17_s13, [#allocation3]  }
  0x11   :  { %108 = dma.done.wait [#allocation3], 64  }
  0x12   :  { %109 = vsyncadd [#allocation3], 4294967232  ;;  %s113_s24 = smov [#allocation5]   ;;  %v27_v0 = vld [vmem:[#allocation2] sm:$0xf] }
  0x13   :  { %s51_s25 = sshll.u32 %s113_s24, 4  ;;  %v60_v1 = vld [vmem:[%s165_s1] ss:$0 sm:$0xff]  ;;  %s52_s25 = int_to_ptr.vmem [resolvable:$true] %s51_s25 }
  0x14   :  { %v61_v2 = vld [vmem:[%s166_s2] ss:$0 sm:$0xff]  ;;  %v35_v3 = vsub.f32 %v27_v0, %v60_v1  ;;  %s86_s30 = scalar_lea.vmem %s52_s25, 64  ;;  %p91_p9 = scmp.lt.s32.totalorder %s52_s25, %s52_s25 }
  0x15   :  { %p87_p8 = scmp.ne.s32.totalorder %s52_s25, %s86_s30  ;;  %p92_p10 = scmp.lt.s32.totalorder %s86_s30, %s86_s30 }
  0x16   :  { %v43_v4 = vmul.f32 %v61_v2, %v35_v3 }
  0x17   :  { %p93_p11 = por %p92_p10, %p91_p9 }
  0x18   :  { %44 = vst [vmem:[#allocation5] sm:$0xf] %v43_v4 }
  0x19   :  { %p94_p12 = pnand %p93_p11, %p87_p8 }
  0x1b   :  { %97 = shalt.err (!%p94_p12)
}
  0x1c   :  { %s98_s5 = scalar_lea.hbm %s167_s3, 64 }
  0x1d   :  { %p99_p13 = scmp.ne.s32.totalorder %s167_s3, %s98_s5  ;;  %p102_p0 = scmp.lt.u32.totalorder %s98_s5, %s167_s3 }
  0x1f   :  { %p104_p1 = pnand %p102_p0, %p99_p13 }
  0x21   :  { %107 = shalt.err (!%p104_p1)
}
  0x22   :  { %54 = dma.vmem_to_hbm [thread:$0]  %s52_s25, 64, %s167_s3, [#allocation4]  }
  0x23   :  { %110 = dma.done.wait [#allocation4], 64  }
  0x24   :  { %111 = vsyncadd [#allocation4], 4294967232 }
  0x25   :  { %58 = vsyncpa [#allocation3], 1 }
  0x26   :  { %59 = vsyncpa [#allocation4], 1 }

</bundles_post_ra>
